<compile_context>
chip_gen: v7x
topology: tpu7x:2x2x1
jax: 0.10.0
libtpu: 0.0.40
codegen_flags: <defaults>
</compile_context>

<pallas_src>
import math

import jax
import jax.numpy as jnp
from jax.experimental import pallas as pl
from jax.experimental.pallas import tpu as pltpu


def _normalize_kernel(x_ref, mu_ref, scale_ref, o_ref):
    # mu_ref / scale_ref are (r, 1) (per-row stats, broadcast along lanes) or
    # (1, c) (per-lane stats, broadcast along sublanes).  Arithmetic in f32,
    # store in the output dtype.  This is HBM-bound; the VPU work is trivial.
    x = x_ref[...].astype(jnp.float32)
    o_ref[...] = ((x - mu_ref[...]) * scale_ref[...]).astype(o_ref.dtype)


def _generation_budget():
    """Return (per-array block target bytes, vmem_limit_bytes or None).

    Budget rule of thumb: x-in + out, double-buffered = 4 blocks of the target
    size (stat tiles are negligible), which must stay under the scoped-VMEM
    limit (16 MiB default on v5e, 32 MiB on v6e/v7x; 64 MiB physical on v7x).
    """
    kind = ""
    try:
        kind = jax.devices()[0].device_kind.lower()
    except Exception:  # pragma: no cover - be robust off-device
        pass
    if "7" in kind:
        # v7x: 3.2 TB/s HBM -> bigger blocks to amortize per-step cost.
        # 4 x 8 MiB = 32 MiB; raise the scoped limit under the 64 MiB physical.
        return 8 * 1024 * 1024, 44 << 20
    if "v6" in kind:
        # v6e: 4 x 6 MiB = 24 MiB fits the 32 MiB scoped default, no flag.
        return 6 * 1024 * 1024, None
    # v5e / older / unknown: 16 MiB scoped default -> 4 x 3 MiB = 12 MiB.
    return 3 * 1024 * 1024, None


def _sublane_quantum(dtype):
    itemsize = jnp.dtype(dtype).itemsize
    if itemsize >= 4:
        return 8
    if itemsize == 2:
        return 16
    return 32


def _pick_blocks(rows, cols, dtype, target_bytes):
    """Pick (row_block, col_block).  row_block is a dtype-native sublane
    multiple (or the full row count); col_block is cols, or a multiple of 128
    when a single minimal-height full-width slab would already exceed the
    per-array VMEM budget (large spatial sizes)."""
    itemsize = jnp.dtype(dtype).itemsize
    q = _sublane_quantum(dtype)

    c_tile = cols
    if q * cols * itemsize > target_bytes and cols % 128 == 0:
        max_lanes = max(128, ((target_bytes // (q * itemsize)) // 128) * 128)
        c_tile = min(cols, max_lanes)

    block_row_bytes = c_tile * itemsize
    if rows <= q:
        r = rows  # full extent (satisfies the (8,128) rule)
    else:
        r = min(rows, max(q, target_bytes // max(block_row_bytes, 1)))
        r = max(q, (r // q) * q)
    return r, c_tile


def _normalize_2d(x2, mu2, scale2, *, per_row):
    rows, cols = x2.shape
    target_bytes, vmem_limit = _generation_budget()
    r, c_tile = _pick_blocks(rows, cols, x2.dtype, target_bytes)

    if c_tile == cols:
        grid = (pl.cdiv(rows, r),)
        x_spec = pl.BlockSpec((r, cols), lambda i: (i, 0))
        out_spec = pl.BlockSpec((r, cols), lambda i: (i, 0))
        if per_row:
            stat_spec = pl.BlockSpec((r, 1), lambda i: (i, 0))
        else:
            stat_spec = pl.BlockSpec((1, cols), lambda i: (0, 0))
        dims = ("parallel",)
    else:
        grid = (pl.cdiv(rows, r), pl.cdiv(cols, c_tile))
        x_spec = pl.BlockSpec((r, c_tile), lambda i, j: (i, j))
        out_spec = pl.BlockSpec((r, c_tile), lambda i, j: (i, j))
        if per_row:
            stat_spec = pl.BlockSpec((r, 1), lambda i, j: (i, 0))
        else:
            stat_spec = pl.BlockSpec((1, c_tile), lambda i, j: (0, j))
        dims = ("parallel", "parallel")

    cost = pl.CostEstimate(
        flops=2 * x2.size,
        transcendentals=0,
        bytes_accessed=2 * x2.size * x2.dtype.itemsize
        + (mu2.size + scale2.size) * 4,
    )

    cp_kwargs = dict(dimension_semantics=dims)
    if vmem_limit is not None:
        cp_kwargs["vmem_limit_bytes"] = vmem_limit

    return pl.pallas_call(
        _normalize_kernel,
        out_shape=jax.ShapeDtypeStruct((rows, cols), x2.dtype),
        grid=grid,
        in_specs=[x_spec, stat_spec, stat_spec],
        out_specs=out_spec,
        compiler_params=pltpu.CompilerParams(**cp_kwargs),
        cost_estimate=cost,
    )(x2, mu2, scale2)


def normalize_layer(x, mu, sigma):
    """(x - mu) / sigma, normalizing across axis 1 (the first non-batch axis).

    x: (N, C, *spatial) or (N, C); mu, sigma: (C,).
    NOTE: uses a precomputed f32 reciprocal of sigma (ULP-level difference vs a
    true divide, identical inf/nan behavior for sigma == 0 up to 0/0 vs 0*inf).
    """
    C = x.shape[1]
    assert mu.shape == (C,) and sigma.shape == (C,)

    mu32 = mu.astype(jnp.float32)
    inv_sigma = 1.0 / sigma.astype(jnp.float32)  # C-length op in the wrapper

    if x.ndim >= 3:
        N = x.shape[0]
        S = math.prod(x.shape[2:])
        x2 = x.reshape(N * C, S)  # lane-dense: last dim = prod(spatial)
        mu_col = jnp.broadcast_to(mu32[None, :], (N, C)).reshape(N * C, 1)
        sc_col = jnp.broadcast_to(inv_sigma[None, :], (N, C)).reshape(N * C, 1)
        out2 = _normalize_2d(x2, mu_col, sc_col, per_row=True)
        return out2.reshape(x.shape)
    elif x.ndim == 2:
        return _normalize_2d(
            x, mu32.reshape(1, C), inv_sigma.reshape(1, C), per_row=False
        )
    else:
        raise ValueError("normalize_layer expects x with ndim >= 2")


if __name__ == "__main__":
    key = jax.random.PRNGKey(0)
    kx, kmu, ksg, kx2, kmu2, ksg2 = jax.random.split(key, 6)

    # CIFAR-style NCHW case: normalize across channels.
    N, C, H, W = 2, 4, 16, 16
    x = jax.random.normal(kx, (N, C, H, W), dtype=jnp.float32)
    mu = jax.random.normal(kmu, (C,), dtype=jnp.float32)
    sigma = jax.random.uniform(ksg, (C,), dtype=jnp.float32, minval=0.5, maxval=2.0)

    out = normalize_layer(x, mu, sigma)
    out = jax.block_until_ready(out)
    ref = (x - mu.reshape(1, C, 1, 1)) / sigma.reshape(1, C, 1, 1)
    assert out.shape == ref.shape and out.dtype == ref.dtype
    assert jnp.allclose(out, ref, atol=1e-6, rtol=1e-6)

    # UCI-style (N, F) case: normalize across features.
    F = 32
    x2d = jax.random.normal(kx2, (2, F), dtype=jnp.float32)
    mu2 = jax.random.normal(kmu2, (F,), dtype=jnp.float32)
    sigma2 = jax.random.uniform(ksg2, (F,), dtype=jnp.float32, minval=0.5, maxval=2.0)

    out2 = normalize_layer(x2d, mu2, sigma2)
    out2 = jax.block_until_ready(out2)
    ref2 = (x2d - mu2[None, :]) / sigma2[None, :]
    assert out2.shape == ref2.shape and out2.dtype == ref2.dtype
    assert jnp.allclose(out2, ref2, atol=1e-6, rtol=1e-6)

    print("KERNEL_OK")
</pallas_src>

<mosaic_0001>
module attributes {stable_mosaic.version = 11 : i64} {
  func.func @_normalize_kernel(%arg0: i32, %arg1: memref<8x256xf32, #tpu.memory_space<vmem>>, %arg2: memref<8x1xf32, #tpu.memory_space<vmem>>, %arg3: memref<8x1xf32, #tpu.memory_space<vmem>>, %arg4: memref<8x256xf32, #tpu.memory_space<vmem>>) attributes {dimension_semantics = [#tpu.dimension_semantics<parallel>], iteration_bounds = array<i64: 1>, scalar_prefetch = 0 : i64, scratch_operands = 0 : i64, tpu.core_type = #tpu.core_type<tc>, window_params = [{transform_indices = @transform_0, window_bounds = array<i64: 8, 256>}, {transform_indices = @transform_1, window_bounds = array<i64: 8, 1>}, {transform_indices = @transform_2, window_bounds = array<i64: 8, 1>}, {transform_indices = @transform_3, window_bounds = array<i64: 8, 256>}]} {
    %c0 = arith.constant 0 : index
    %c0_0 = arith.constant 0 : index
    %0 = vector.load %arg1[%c0, %c0_0] : memref<8x256xf32, #tpu.memory_space<vmem>>, vector<8x256xf32>
    %c0_1 = arith.constant 0 : index
    %c0_2 = arith.constant 0 : index
    %1 = vector.load %arg2[%c0_1, %c0_2] : memref<8x1xf32, #tpu.memory_space<vmem>>, vector<8x1xf32>
    %2 = vector.broadcast %1 : vector<8x1xf32> to vector<8x256xf32>
    %3 = arith.subf %0, %2 : vector<8x256xf32>
    %c0_3 = arith.constant 0 : index
    %c0_4 = arith.constant 0 : index
    %4 = vector.load %arg3[%c0_3, %c0_4] : memref<8x1xf32, #tpu.memory_space<vmem>>, vector<8x1xf32>
    %5 = vector.broadcast %4 : vector<8x1xf32> to vector<8x256xf32>
    %6 = arith.mulf %3, %5 : vector<8x256xf32>
    %c0_5 = arith.constant 0 : index
    %c0_6 = arith.constant 0 : index
    %7 = vector.load %arg4[%c0_5, %c0_6] : memref<8x256xf32, #tpu.memory_space<vmem>>, vector<8x256xf32>
    tpu.vector_store %arg4[%c0_5, %c0_6], %6 {strides = array<i32>} : memref<8x256xf32, #tpu.memory_space<vmem>>, vector<8x256xf32>,
    return
  }
  func.func @transform_0(%arg0: i32) -> (i32, i32) {
    %c0_i32 = arith.constant 0 : i32
    %c0_i32_0 = arith.constant 0 : i32
    return %arg0, %c0_i32 : i32, i32
  }
  func.func @transform_1(%arg0: i32) -> (i32, i32) {
    %c0_i32 = arith.constant 0 : i32
    %c0_i32_0 = arith.constant 0 : i32
    return %arg0, %c0_i32 : i32, i32
  }
  func.func @transform_2(%arg0: i32) -> (i32, i32) {
    %c0_i32 = arith.constant 0 : i32
    %c0_i32_0 = arith.constant 0 : i32
    return %arg0, %c0_i32 : i32, i32
  }
  func.func @transform_3(%arg0: i32) -> (i32, i32) {
    %c0_i32 = arith.constant 0 : i32
    %c0_i32_0 = arith.constant 0 : i32
    return %arg0, %c0_i32 : i32, i32
  }
}

</mosaic_0001>

<bundles_post_ra>
// kernel: tpu_custom_call.1
= control target key start
LH: loop header
LB: loop body
LE: loop exit
PB: predicated region body
PF: predicated region fallthrough
CT: control target
= control target key end

     0   :  { %s122_s0 = inlined_call_operand.vmem [shape: f32[8,256], index: 0, kind: input, shape index: {}]   ;;  %s123_s1 = inlined_call_operand.vmem [shape: f32[8,1], index: 1, kind: input, shape index: {}]   ;;  %s124_s2 = inlined_call_operand.vmem [shape: f32[8,1], index: 2, kind: input, shape index: {}]   ;;  %s125_s3 = inlined_call_operand.hbm [shape: f32[8,256], index: 3, kind: output, shape index: {}]  }
   0x1   :  { %v17_v0 = vld [vmem:[%s123_s1] sm:$0xff] }
   0x2   :  { %8 = vsyncpa [#allocation3], 0  ;;  %v76_v1 = vmov 0   ;;  %v25_v2 = vld [vmem:[%s124_s2] sm:$0xff]  ;;  %v16_v5 = vld [vmem:[%s122_s0 + $0x8] sm:$0xff]  ;;  %s77_s20 = smov [#allocation2]  }
   0x3   :  { %51 = vset.pattern.permute.xlu0 %v76_v1  ;;  %v15_v4 = vld [vmem:[%s122_s0] sm:$0xff]  ;;  %s41_s1 = sshll.u32 %s77_s20, 4  ;;  %s42_s1 = int_to_ptr.vmem [resolvable:$true] %s41_s1 }
   0x4   :  { %20 = vperm.xlu0 %51, %v17_v0   ;;  %s52_s2 = scalar_lea.vmem %s42_s1, 256  ;;  %p57_p1 = scmp.lt.s32.totalorder %s42_s1, %s42_s1 }
   0x5   :  { %p53_p0 = scmp.ne.s32.totalorder %s42_s1, %s52_s2  ;;  %p58_p2 = scmp.lt.s32.totalorder %s52_s2, %s52_s2 }
   0x7   :  { %p59_p3 = por %p58_p2, %p57_p1 }
   0x8   :  { %28 = vperm.xlu0 %51, %v25_v2  }
   0x9   :  { %p60_p4 = pnand %p59_p3, %p53_p0 }
  0x83   :  { %v21_v3 = vpop.permute.xlu0 %20 }
  0x84   :  { %v23_v6 = vsub.f32 %v15_v4, %v21_v3  ;;  %v24_v7 = vsub.f32 %v16_v5, %v21_v3 }
  0x87   :  { %v29_v8 = vpop.permute.xlu0 %28 }
  0x88   :  { %v31_v9 = vmul.f32 %v29_v8, %v23_v6  ;;  %v32_v10 = vmul.f32 %v29_v8, %v24_v7 }
  0x8a   :  { %33 = vst [vmem:[#allocation2] sm:$0xff] %v31_v9  ;;  %34 = vst [vmem:[#allocation2 + $0x8] sm:$0xff] %v32_v10 }
  0x8b   :  { %63 = shalt.err (!%p60_p4)
}
  0x8c   :  { %s64_s0 = scalar_lea.hbm %s125_s3, 256 }
  0x8d   :  { %p65_p5 = scmp.ne.s32.totalorder %s125_s3, %s64_s0  ;;  %p68_p6 = scmp.lt.u32.totalorder %s64_s0, %s125_s3 }
  0x8f   :  { %p70_p7 = pnand %p68_p6, %p65_p5 }
  0x91   :  { %73 = shalt.err (!%p70_p7)
}
  0x92   :  { %44 = dma.vmem_to_hbm [thread:$0]  %s42_s1, 256, %s125_s3, [#allocation3]  }
  0x93   :  { %74 = dma.done.wait [#allocation3], 256  }
  0x94   :  { %75 = vsyncadd [#allocation3], 4294967040 }
  0x95   :  { %48 = vsyncpa [#allocation3], 1 }

</bundles_post_ra>
